<compile_context>
chip_gen: v7x
topology: tpu7x:2x2x1
jax: 0.10.0
libtpu: 0.0.40
codegen_flags: <defaults>
</compile_context>

<pallas_src>
import jax
import jax.numpy as jnp
from jax.experimental import pallas as pl
from jax.experimental.pallas import tpu as pltpu

# ---- static configuration -------------------------------------------------
N_BRANCHES = 3
C_IN = 32
C_OUT = 32

MAX_TILE_HW = 16384                       # columns (H*W) per tile; mult. of 128
TARGET_X_BLOCK_BYTES = 2 * 1024 * 1024    # ~2 MiB x-block per grid step
VMEM_LIMIT_BYTES = 32 * 1024 * 1024       # safe on v5e/v6e (128 MiB) & v7x (64 MiB)


def _round_up(x, m):
    return ((x + m - 1) // m) * m


def _fused_conv_sum_kernel(x_ref, wT_ref, b_ref, o_ref):
    """x_ref : (NB, C_IN, TILE_HW)   activation block (NCHW-native)
       wT_ref: (C_OUT, C_IN)         pre-summed, transposed 1x1 conv weight
       b_ref : (C_OUT, 1)            pre-summed bias (column vector)
       o_ref : (NB, C_OUT, TILE_HW)  output block
    Computes  o[b] = W_sum^T @ x[b] + b_sum  (== sum over branches of 1x1 conv)."""
    w = wT_ref[...]
    bias = b_ref[...]
    for bi in range(x_ref.shape[0]):      # static unroll over batch slices
        acc = jnp.dot(w, x_ref[bi], preferred_element_type=jnp.float32)
        o_ref[bi] = (acc + bias).astype(o_ref.dtype)


def multi_with_const_forward(x_nchw, weights, biases, *,
                             max_tile_hw=MAX_TILE_HW,
                             target_block_bytes=TARGET_X_BLOCK_BYTES):
    """x_nchw : [N, C_IN, H, W] float32
       weights: [N_BRANCHES, C_IN, C_OUT] float32 (1x1 conv kernels per branch)
       biases : [N_BRANCHES, C_OUT]       float32
       Returns [N, C_OUT, H, W] = sum_b conv1x1(x; weights[b], biases[b])."""
    n, c, h, w = x_nchw.shape
    assert c == C_IN
    hw = h * w
    itemsize = jnp.dtype(x_nchw.dtype).itemsize

    # ---- branch folding (one-time, tiny) ----------------------------------
    w_sum = jnp.sum(weights, axis=0)          # (C_IN, C_OUT)
    b_sum = jnp.sum(biases, axis=0)           # (C_OUT,)
    wT = jnp.transpose(w_sum)                 # (C_OUT, C_IN)
    b_col = b_sum[:, None]                    # (C_OUT, 1)

    # ---- native NCHW flattening (free reshape, no HBM transpose) ----------
    x_flat = x_nchw.reshape(n, c, hw)         # (N, C_IN, HW)

    # ---- column-tile selection: balanced, lane-dense, no HBM padding ------
    hw128 = _round_up(hw, 128)
    n_col_tiles = pl.cdiv(hw128, max_tile_hw)
    tile_hw = _round_up(pl.cdiv(hw128, n_col_tiles), 128)
    if hw < 128:
        tile_hw = hw                          # full-extent last dim (tiny case)

    # ---- batch blocking: keep each x block ~2 MiB --------------------------
    per_batch_bytes = C_IN * tile_hw * itemsize
    nb = max(1, min(n, target_block_bytes // per_batch_bytes))

    grid_n = pl.cdiv(n, nb)
    grid_c = pl.cdiv(hw, tile_hw)
    # v7x has 2 TensorCores: make sure there are >=2 parallel steps if possible.
    if grid_n * grid_c < 2:
        if n >= 2:
            nb = _round_up(n, 2) // 2
            grid_n = pl.cdiv(n, nb)
        elif hw > 128:
            tile_hw = _round_up(pl.cdiv(tile_hw, 2), 128)
            grid_c = pl.cdiv(hw, tile_hw)

    grid = (grid_n, grid_c)

    cost = pl.CostEstimate(
        flops=2 * C_IN * C_OUT * n * hw,
        transcendentals=0,
        bytes_accessed=itemsize * (C_IN + C_OUT) * n * hw,
    )

    out_flat = pl.pallas_call(
        _fused_conv_sum_kernel,
        out_shape=jax.ShapeDtypeStruct((n, C_OUT, hw), x_nchw.dtype),
        grid_spec=pltpu.PrefetchScalarGridSpec(
            num_scalar_prefetch=0,
            grid=grid,
            in_specs=[
                pl.BlockSpec((nb, C_IN, tile_hw), lambda i, j: (i, 0, j)),
                pl.BlockSpec((C_OUT, C_IN), lambda i, j: (0, 0)),
                pl.BlockSpec((C_OUT, 1), lambda i, j: (0, 0)),
            ],
            out_specs=pl.BlockSpec((nb, C_OUT, tile_hw), lambda i, j: (i, 0, j)),
        ),
        compiler_params=pltpu.CompilerParams(
            dimension_semantics=("parallel", "parallel"),
            vmem_limit_bytes=VMEM_LIMIT_BYTES,
        ),
        cost_estimate=cost,
    )(x_flat, wT, b_col)

    return out_flat.reshape(n, C_OUT, h, w)


if __name__ == "__main__":
    key = jax.random.PRNGKey(0)
    k_x, k_w, k_b = jax.random.split(key, 3)

    # small shapes: batch=2, channels=32, spatial=16x16
    x = jax.random.normal(k_x, (2, C_IN, 16, 16), dtype=jnp.float32)
    weights = jax.random.normal(
        k_w, (N_BRANCHES, C_IN, C_OUT), dtype=jnp.float32
    ) * 0.1
    biases = jax.random.normal(k_b, (N_BRANCHES, C_OUT), dtype=jnp.float32) * 0.1

    out = multi_with_const_forward(x, weights, biases)
    out = jax.block_until_ready(out)

    # pure-JAX reference: per-branch 1x1 conv + bias, summed (original order)
    ref = sum(
        jnp.einsum("ncij,co->noij", x, weights[b])
        + biases[b][None, :, None, None]
        for b in range(N_BRANCHES)
    )
    assert out.shape == (2, C_OUT, 16, 16)
    assert jnp.allclose(out, ref, atol=1e-4, rtol=1e-4)

    print("KERNEL_OK")
</pallas_src>

<mosaic_0001>
module attributes {stable_mosaic.version = 11 : i64} {
  func.func @_fused_conv_sum_kernel(%arg0: i32, %arg1: i32, %arg2: memref<1x32x256xf32, #tpu.memory_space<vmem>>, %arg3: memref<32x32xf32, #tpu.memory_space<vmem>>, %arg4: memref<32x1xf32, #tpu.memory_space<vmem>>, %arg5: memref<1x32x256xf32, #tpu.memory_space<vmem>>) attributes {dimension_semantics = [#tpu.dimension_semantics<parallel>, #tpu.dimension_semantics<parallel>], iteration_bounds = array<i64: 2, 1>, scalar_prefetch = 0 : i64, scratch_operands = 0 : i64, tpu.core_type = #tpu.core_type<tc>, window_params = [{transform_indices = @transform_0, window_bounds = array<i64: 1, 32, 256>}, {pipeline_mode = #tpu.pipeline_mode<synchronous>, transform_indices = @transform_1, window_bounds = array<i64: 32, 32>}, {pipeline_mode = #tpu.pipeline_mode<synchronous>, transform_indices = @transform_2, window_bounds = array<i64: 32, 1>}, {transform_indices = @transform_3, window_bounds = array<i64: 1, 32, 256>}]} {
    %c0 = arith.constant 0 : index
    %c0_0 = arith.constant 0 : index
    %0 = vector.load %arg3[%c0, %c0_0] : memref<32x32xf32, #tpu.memory_space<vmem>>, vector<32x32xf32>
    %c0_1 = arith.constant 0 : index
    %c0_2 = arith.constant 0 : index
    %1 = vector.load %arg4[%c0_1, %c0_2] : memref<32x1xf32, #tpu.memory_space<vmem>>, vector<32x1xf32>
    %c0_3 = arith.constant 0 : index
    %c0_4 = arith.constant 0 : index
    %c0_5 = arith.constant 0 : index
    %2 = vector.load %arg2[%c0_3, %c0_4, %c0_5] : memref<1x32x256xf32, #tpu.memory_space<vmem>>, vector<1x32x256xf32>
    %3 = vector.shape_cast %2 : vector<1x32x256xf32> to vector<32x256xf32>
    %cst = arith.constant dense<0.000000e+00> : vector<32x256xf32>
    %4 = tpu.matmul %0, %3, %cst {dimension_numbers = #tpu.dot_dimension_numbers<[1], [0], [0], [1], [0, 0, 1, 1], [], []>} : vector<32x32xf32>, vector<32x256xf32>, vector<32x256xf32> -> vector<32x256xf32>
    %5 = vector.broadcast %1 : vector<32x1xf32> to vector<32x256xf32>
    %6 = arith.addf %4, %5 : vector<32x256xf32>
    %c0_6 = arith.constant 0 : index
    %c0_7 = arith.constant 0 : index
    %c0_8 = arith.constant 0 : index
    %7 = vector.load %arg5[%c0_6, %c0_7, %c0_8] : memref<1x32x256xf32, #tpu.memory_space<vmem>>, vector<1x32x256xf32>
    %8 = vector.shape_cast %7 : vector<1x32x256xf32> to vector<32x256xf32>
    %9 = vector.shape_cast %6 : vector<32x256xf32> to vector<1x32x256xf32>
    tpu.vector_store %arg5[%c0_6, %c0_7, %c0_8], %9 {strides = array<i32>} : memref<1x32x256xf32, #tpu.memory_space<vmem>>, vector<1x32x256xf32>,
    return
  }
  func.func @transform_0(%arg0: i32, %arg1: i32) -> (i32, i32, i32) {
    %c0_i32 = arith.constant 0 : i32
    %c0_i32_0 = arith.constant 0 : i32
    return %arg0, %c0_i32, %arg1 : i32, i32, i32
  }
  func.func @transform_1(%arg0: i32, %arg1: i32) -> (i32, i32) {
    %c0_i32 = arith.constant 0 : i32
    %c0_i32_0 = arith.constant 0 : i32
    %c0_i32_1 = arith.constant 0 : i32
    return %c0_i32, %c0_i32_0 : i32, i32
  }
  func.func @transform_2(%arg0: i32, %arg1: i32) -> (i32, i32) {
    %c0_i32 = arith.constant 0 : i32
    %c0_i32_0 = arith.constant 0 : i32
    %c0_i32_1 = arith.constant 0 : i32
    return %c0_i32, %c0_i32_0 : i32, i32
  }
  func.func @transform_3(%arg0: i32, %arg1: i32) -> (i32, i32, i32) {
    %c0_i32 = arith.constant 0 : i32
    %c0_i32_0 = arith.constant 0 : i32
    return %arg0, %c0_i32, %arg1 : i32, i32, i32
  }
}

</mosaic_0001>

<bundles_post_ra>
// kernel: tpu_custom_call.1
= control target key start
LH: loop header
LB: loop body
LE: loop exit
PB: predicated region body
PF: predicated region fallthrough
CT: control target
= control target key end

     0   :  { %8 = vsyncpa [#allocation3], 0  ;;  %s906_s0 = inlined_call_operand.hbm [shape: f32[2,32,256], index: 0, kind: input, shape index: {}]   ;;  %s907_s1 = inlined_call_operand.vmem [shape: f32[32,32], index: 1, kind: input, shape index: {}]   ;;  %s908_s2 = inlined_call_operand.vmem [shape: f32[32,1], index: 2, kind: input, shape index: {}]   ;;  %s909_s3 = inlined_call_operand.hbm [shape: f32[2,32,256], index: 3, kind: output, shape index: {}]  }
   0x1   :  { %10 = vsyncpa [#allocation3 + $0x1], 0 }
   0x2   :  { %11 = vsyncpa [#allocation4], 0 }
   0x3   :  { %13 = vsyncpa [#allocation4 + $0x1], 0  ;;  %s703_s12 = smov 0   ;;  %s705_s13 = smov 0  }
   0x4   :  { %s707_s14 = smov 0   ;;  %s709_s15 = smov 0  }
   0x5   :  { %s711_s16 = smov 0   ;;  %s713_s17 = smov 0  }
   0x6 LB: > { %s458_s18 = sadd.s32 4294967295, %s673_s17   ;;  %s459_s19 = sadd.s32 4294967294, %s673_s17   ;;  %s673_s17 = sphi %s713_s17, %s19_s17   ;;  %s669_s16 = sphi %s711_s16, %s924_s16   ;;  %s665_s15 = sphi %s709_s15, %s923_s15   ;;  %s661_s14 = sphi %s707_s14, %s922_s14   ;;  %s657_s13 = sphi %s705_s13, %s921_s13   ;;  %s653_s12 = sphi %s703_s12, %s920_s12  }
   0x7   : > { %s31_s20 = sadd.s32 1, %s669_s16  ;;  %s40_s21 = sadd.s32 1, %s661_s14 }
   0x8   : > { %p33_p0 = scmp.ge.s32.totalorder %s31_s20, 2  ;;  %p47_p1 = scmp.ne.s32.totalorder %s661_s14, %s657_s13 }
   0x9   : > { %p48_p2 = scmp.eq.s32.totalorder %s673_s17, 0  ;;  %p53_p3 = scmp.ne.s32.totalorder %s657_s13, %s653_s12 }
   0xa   : > { %s926_s20 = smov (%p33_p0, %s31_s20), 0  ;;  %p54_p5 = scmp.eq.s32.totalorder %s458_s18, 0 }
   0xb   : > { %p744_p4 = por %p48_p2, %p47_p1  ;;  %s35_s23 = ssub.s32 %s669_s16, %s926_s20 }
   0xc   : > { %p121_p6 = scmp.eq.s32.totalorder %s458_s18, 1  ;;  %p38_p7 = scmp.eq.s32.totalorder %s35_s23, 0 }
   0xd   : > { %p750_p8 = por %p54_p5, %p53_p3  ;;  %p127_p10 = scmp.eq.s32.totalorder %s459_s19, 1 }
   0xe   : > { %p754_p9 = por %p121_p6, %p47_p1  ;;  %p503_p13 = scmp.lt.s32.totalorder %s673_s17, 2 }
   0xf   : > { %s759_s26 = scalar_select %p38_p7, %s661_s14, %s40_s21  }
  0x10   : > { %s913_s25 = scalar_select %p754_p9, 1, 0 }
  0x11   : > { %p761_p11 = por %p127_p10, %p53_p3  ;;  %s153_s28 = sand.u32 1, %s661_s14  }
  0x12   : > { %s462_s29 = sshll.u32 %s153_s28, 6  ;;  %s477_s30 = sshll.u32 %s669_s16, 10 }
  0x13   : > { %s914_s27 = scalar_select %p761_p11, 1, 0 }
  0x14   : > { %s772_s6 = scalar_lea.hbm %s906_s0, %s477_s30  ;;  %s157_s7 = scalar_lea.vmem [#allocation2], %s462_s29 }
  0x15   : > { %s166_s8 = sshll.u32 %s157_s7, 4  ;;  %p778_p0 = pnand %p503_p13, %p744_p4  ;;  %s774_s8 = int_to_ptr.vmem [resolvable:$true] %s166_s8 }
  0x16   : > { %s783_s10 = scalar_lea.sflag [#allocation3], %s153_s28  ;;  %s561_s11 = scalar_lea.hbm %s772_s6, 1024 }
  0x17   : > { %p562_p2 = scmp.ne.s32.totalorder %s772_s6, %s561_s11  ;;  %p563_p3 = pneg %p778_p0 }
  0x18   : > { %s566_s21 = scalar_lea.hbm %s906_s0, 2048  ;;  %p567_p4 = scmp.lt.u32.totalorder %s772_s6, %s906_s0 }
  0x19   : > { %p564_p5 = pnand %p563_p3, %p562_p2  ;;  %p568_p7 = scmp.lt.u32.totalorder %s566_s21, %s561_s11 }
  0x1a   : > { %p570_p13 = scmp.lt.u32.totalorder %s561_s11, %s772_s6 }
  0x1b   : > { %p565_p6 = pneg %p564_p5  ;;  %p569_p10 = por %p568_p7, %p567_p4 }
  0x1d   : > { %p571_p12 = por %p570_p13, %p569_p10 }
  0x1f   : > { %p572_p1 = pnand %p571_p12, %p565_p6 }
  0x21   : > { %575 = shalt.err (!%p572_p1)
}
  0x22   : > { %s576_s28 = scalar_lea.vmem %s774_s8, 1024  ;;  %s675_s29 = smov [#allocation2]  }
  0x23   : > { %p577_p2 = scmp.ne.s32.totalorder %s774_s8, %s576_s28  ;;  %s581_s30 = sshll.u32 %s675_s29, 4  ;;  %s582_s30 = int_to_ptr.vmem [resolvable:$false] %s581_s30 }
  0x24   : > { %s583_s4 = scalar_lea.vmem %s582_s30, 2048  ;;  %p584_p9 = scmp.lt.s32.totalorder %s774_s8, %s582_s30 }
  0x25   : > { %p579_p5 = pnand %p577_p2, %p563_p3  ;;  %p585_p4 = scmp.lt.s32.totalorder %s583_s4, %s576_s28 }
  0x27   : > { %p580_p11 = pneg %p579_p5  ;;  %p586_p7 = por %p585_p4, %p584_p9 }
  0x29   : > { %p587_p10 = pnand %p586_p7, %p580_p11 }
  0x2b   : > { %590 = shalt.err (!%p587_p10)
}
  0x2c   : > { %s676_s5 = smov 256   ;;  %s677_s7 = smov 16  }
  0x2d   : > { %498 = dma.hbm_to_vmem [thread:$0]  (!%p778_p0), %s772_s6, 1024, %s774_s8, %s783_s10, %s676_s5, %s676_s5, %s677_s7  }
  0x2e   : > { %p174_p12 = scmp.lt.s32.totalorder %s673_s17, 3  ;;  %p916_p1 = scmp.ge.s32.totalorder %s673_s17, 1 }
  0x30   : > { %p175_p3 = pnand %p916_p1, %p174_p12 }
  0x31   : > { %s815_s11 = sand.u32 (!%p175_p3), 1, %s657_s13  }
  0x32   : > { %178 = sbr.rel (%p175_p3) target bundleno = 303 (0x12f), region = 32  ;;  %s466_s18 = sshll.u32 (!%p175_p3), %s815_s11, 6 }
  0x33   : > { %s181_s19 = scalar_lea.sflag (!%p175_p3), [#allocation3], %s815_s11  ;;  %s184_s21 = scalar_lea.vmem (!%p175_p3), [#allocation2], %s466_s18 }
  0x39   : > { %644 = dma.done.wait (%p750_p8), %s181_s19, 1024  }
  0x3a   : > { %646 = vsyncadd (%p750_p8), %s181_s19, 4294966272  ;;  %v678_v0 = vmov 0.0   ;;  %v679_v1 = vmov 0   ;;  %v218_v2 = vld [vmem:[%s184_s21 + $0x8] sm:$0xff]  ;;  %v220_v3 = vld [vmem:[%s184_s21 + $0x18] sm:$0xff]  ;;  %vm245_vm0 = vcmask 261120  }
  0x3b   : > { %322 = vmatprep.mubr.f32.mxu0 %v678_v0  ;;  %334 = vmatprep.mubr.f32.mxu1 %v678_v0  ;;  %v217_v4 = vld [vmem:[%s184_s21] sm:$0xff]  ;;  %v479_v5 = vpack.c.bf16 %v220_v3, %v218_v2  ;;  %v219_v6 = vld [vmem:[%s184_s21 + $0x10] sm:$0xff]  ;;  %v222_v7 = vld [vmem:[%s184_s21 + $0x28] sm:$0xff]  ;;  %s206_s6 = scalar_lea.vmem [#allocation5], %s466_s18  ;;  %s478_s9 = sshll.u32 %s665_s15, 10 }
  0x3c   : > { %560 = vset.pattern.permute.xlu1 %v679_v1  ;;  %559 = vset.pattern.permute.xlu0 %v679_v1  ;;  %v224_v8 = vld [vmem:[%s184_s21 + $0x38] sm:$0xff]  ;;  %v481_v9 = vpack.c.bf16 %v219_v6, %v217_v4  ;;  %v221_v11 = vld [vmem:[%s184_s21 + $0x20] sm:$0xff]  ;;  %v223_v12 = vld [vmem:[%s184_s21 + $0x30] sm:$0xff]  ;;  %s371_s8 = sshll.u32 %s206_s6, 4  ;;  %s857_s10 = scalar_lea.hbm %s909_s3, %s478_s9  ;;  %s852_s8 = int_to_ptr.vmem [resolvable:$true] %s371_s8 }
  0x3d   : > { %v483_v10 = vpack.c.bf16 %v224_v8, %v222_v7  ;;  %480 = vmatprep.subr.bf16.mxu0 %v479_v5  ;;  %487 = vmatprep.subr.bf16.mxu1 %v479_v5  ;;  %v485_v13 = vpack.c.bf16 %v223_v12, %v221_v11  ;;  %v215_v14 = vld [vmem:[%s908_s2 + $0x10] sm:$0xff]  ;;  %v213_v15 = vld [vmem:[%s908_s2] sm:$0xff]  ;;  %v216_v16 = vld [vmem:[%s908_s2 + $0x18] sm:$0xff]  ;;  %s356_s22 = scalar_lea.sflag [#allocation4], %s815_s11  ;;  %s591_s23 = scalar_lea.vmem %s852_s8, 1024 }
  0x3e   : > { %482 = vmatpush1.bf16.msra.mxu0 %v481_v9  ;;  %489 = vmatpush1.bf16.msra.mxu1 %v481_v9  ;;  %v214_v17 = vld [vmem:[%s908_s2 + $0x8] sm:$0xff]  ;;  %v209_v18 = vld [vmem:[%s907_s1] sm:$0xff]  ;;  %v211_v19 = vld [vmem:[%s907_s1 + $0x10] sm:$0xff]  ;;  %p592_p8 = scmp.ne.s32.totalorder %s852_s8, %s591_s23  ;;  %p917_p9 = scmp.ne.s32.totalorder %s913_s25, 0 }
  0x3f   : > { %484 = vmatprep.subr.bf16.mxu0 %v483_v10  ;;  %488 = vmatprep.subr.bf16.mxu1 %v483_v10  ;;  %v210_v20 = vld [vmem:[%s907_s1 + $0x8] sm:$0xff]  ;;  %v212_v21 = vld [vmem:[%s907_s1 + $0x18] sm:$0xff]  ;;  %s680_s28 = smov [#allocation5]  }
  0x40   : > { %237 = vperm.xlu1 %560, %v215_v14   ;;  %227 = vperm.xlu0 %559, %v213_v15   ;;  %p593_p11 = pnand %p592_p8, %p917_p9  ;;  %s595_s29 = sshll.u32 %s680_s28, 4  ;;  %s596_s29 = int_to_ptr.vmem [resolvable:$false] %s595_s29 }
  0x41   : > { %s597_s30 = scalar_lea.vmem %s596_s29, 2048  ;;  %p598_p6 = scmp.lt.s32.totalorder %s852_s8, %s596_s29 }
  0x42   : > { %486 = vmatpush1.bf16.msra.mxu0 %v485_v13  ;;  %490 = vmatpush1.bf16.msra.mxu1 %v485_v13  ;;  %p594_p0 = pneg %p593_p11  ;;  %p599_p13 = scmp.lt.s32.totalorder %s597_s30, %s591_s23 }
  0x44   : > { %242 = vperm.xlu1 %560, %v216_v16   ;;  %232 = vperm.xlu0 %559, %v214_v17   ;;  %p600_p2 = por %p599_p13, %p598_p6 }
  0x45   : > { %468 = vmatmul.mubr.msk.f32.vlgmr.msra.gmra.mrb[0].mxu0 %vm245_vm0, %v209_v18  ;;  %470 = vmatmul.mubr.msk.f32.vlgmr.msra.gmra.mrb[0].mxu1 %vm245_vm0, %v211_v19 }
  0x46   : > { %328 = vmatprep.mubr.f32.mxu0 %v678_v0  ;;  %340 = vmatprep.mubr.f32.mxu1 %v678_v0  ;;  %p601_p5 = pnand %p600_p2, %p594_p0 }
  0x49   : > { %469 = vmatmul.mubr.msk.f32.gmra.mrb[2].mxu0 %vm245_vm0, %v210_v20  ;;  %471 = vmatmul.mubr.msk.f32.gmra.mrb[2].mxu1 %vm245_vm0, %v212_v21 }
  0xbf   : > { %v238_v22 = vpop.permute.xlu1 %237  ;;  %v228_v23 = vpop.permute.xlu0 %227 }
  0xc3   : > { %v243_v32 = vpop.permute.xlu1 %242  ;;  %v233_v33 = vpop.permute.xlu0 %232 }
 0x118   : > { %v324_v24 = vpop.f32.mrb[0].mxu0  ;;  %v336_v25 = vpop.f32.mrb[0].mxu1 }
 0x119   : > { %v325_v26 = vadd.f32 %v324_v24, %v228_v23  ;;  %v337_v27 = vadd.f32 %v336_v25, %v238_v22  ;;  %v326_v28 = vpop.f32.mrb[1].mxu0  ;;  %v338_v29 = vpop.f32.mrb[1].mxu1 }
 0x11a   : > { %v327_v30 = vadd.f32 %v326_v28, %v228_v23  ;;  %v339_v31 = vadd.f32 %v338_v29, %v238_v22 }
 0x11b   : > { %347 = vst [vmem:[%s206_s6] sm:$0xff] %v325_v26  ;;  %351 = vst [vmem:[%s206_s6 + $0x20] sm:$0xff] %v337_v27 }
 0x11c   : > { %348 = vst [vmem:[%s206_s6 + $0x8] sm:$0xff] %v327_v30  ;;  %352 = vst [vmem:[%s206_s6 + $0x28] sm:$0xff] %v339_v31  ;;  %v330_v34 = vpop.f32.mrb[2].mxu0  ;;  %v342_v35 = vpop.f32.mrb[2].mxu1 }
 0x11d   : > { %v331_v36 = vadd.f32 %v330_v34, %v233_v33  ;;  %v343_v37 = vadd.f32 %v342_v35, %v243_v32  ;;  %v332_v38 = vpop.f32.mrb[3].mxu0  ;;  %v344_v39 = vpop.f32.mrb[3].mxu1 }
 0x11e   : > { %v333_v40 = vadd.f32 %v332_v38, %v233_v33  ;;  %v345_v41 = vadd.f32 %v344_v39, %v243_v32 }
 0x11f   : > { %349 = vst [vmem:[%s206_s6 + $0x10] sm:$0xff] %v331_v36  ;;  %353 = vst [vmem:[%s206_s6 + $0x30] sm:$0xff] %v343_v37 }
 0x120   : > { %350 = vst [vmem:[%s206_s6 + $0x18] sm:$0xff] %v333_v40  ;;  %354 = vst [vmem:[%s206_s6 + $0x38] sm:$0xff] %v345_v41 }
 0x121   : > { %604 = shalt.err (!%p601_p5)
}
 0x122   : > { %s605_s4 = scalar_lea.hbm %s857_s10, 1024  ;;  %s609_s19 = scalar_lea.hbm %s909_s3, 2048 }
 0x123   : > { %p606_p4 = scmp.ne.s32.totalorder %s857_s10, %s605_s4  ;;  %p610_p12 = scmp.lt.u32.totalorder %s857_s10, %s909_s3 }
 0x124   : > { %p611_p1 = scmp.lt.u32.totalorder %s609_s19, %s605_s4  ;;  %p613_p8 = scmp.lt.u32.totalorder %s605_s4, %s857_s10 }
 0x125   : > { %p607_p7 = pnand %p606_p4, %p917_p9 }
 0x126   : > { %p612_p3 = por %p611_p1, %p610_p12 }
 0x127   : > { %p608_p10 = pneg %p607_p7 }
 0x128   : > { %p614_p11 = por %p613_p8, %p612_p3 }
 0x12a   : > { %p615_p0 = pnand %p614_p11, %p608_p10 }
 0x12c   : > { %618 = shalt.err (!%p615_p0)
}
 0x12d   : > { %s681_s6 = smov 256   ;;  %s682_s9 = smov 16  }
 0x12e   : > { %493 = dma.vmem_to_hbm [thread:$0]  (%p917_p9), %s852_s8, 1024, %s857_s10, %s356_s22, %s681_s6, %s681_s6, %s682_s9  }
 0x12f PF: > { %s386_s18 = sand.u32 1, %s653_s12   ;;  %p918_p6 = scmp.ne.s32.totalorder %s914_s27, 0 }
 0x130   : > { %p919_p13 = scmp.ge.s32.totalorder %s673_s17, 2  ;;  %s387_s15 = scalar_lea.sflag [#allocation4], %s386_s18 }
 0x132   : > { %p500_p2 = pnand %p919_p13, %p918_p6 }
 0x134   : > { %648 = dma.done.wait (!%p500_p2), %s387_s15, 1024  }
 0x135   : > { %650 = vsyncadd (!%p500_p2), %s387_s15, 4294966272  ;;  %s19_s17 = sadd.s32 1, %s673_s17   ;;  %s920_s12 = smov %s657_s13 }
 0x136   : > { %p16_p5 = scmp.ge.s32.totalorder %s19_s17, 4   ;;  %s921_s13 = smov %s661_s14 }
 0x137   : > { %s922_s14 = smov %s759_s26  ;;  %s923_s15 = smov %s669_s16 }
 0x138   : > { %s924_s16 = smov %s926_s20  ;;  %18 = sbr.rel (!%p16_p5) target bundleno = 6 (0x6), region = 77 }
 0x13f   :  { %392 = vsyncpa [#allocation3], 1 }
 0x140   :  { %394 = vsyncpa [#allocation3 + $0x1], 1 }
 0x141   :  { %395 = vsyncpa [#allocation4], 1 }
 0x142   :  { %397 = vsyncpa [#allocation4 + $0x1], 1 }

</bundles_post_ra>
